<compile_context>
chip_gen: v7x
topology: tpu7x:2x2x1
jax: 0.10.0
libtpu: 0.0.40
codegen_flags: <defaults>
</compile_context>

<pallas_src>
import math
import jax
import jax.numpy as jnp
from jax.experimental import pallas as pl
from jax.experimental.pallas import tpu as pltpu


def _round_up(x, m):
    return ((x + m - 1) // m) * m


def _embed_kernel(cid_ref, aid_ref, ctab_ref, atab_ref, out_ref):
    """One row tile of the fused embedding lookup.

    cid_ref, aid_ref : (TILE_N, 1) int32   class / api token ids
    ctab_ref         : (VC_PAD, DC)        class table, pre-scaled, row 0 == 0
    atab_ref         : (VA_PAD, DA)        api   table, pre-scaled, row 0 == 0
    out_ref          : (TILE_N, DC+DA)     token-major output tile
    """
    tile_n = out_ref.shape[0]
    vc_pad = ctab_ref.shape[0]
    va_pad = atab_ref.shape[0]

    cids = cid_ref[...]                          # (TILE_N, 1)
    aids = aid_ref[...]                          # (TILE_N, 1)

    # One-hot gathers, each restricted to its own sub-vocab (no block-diagonal
    # padding, no logical_or): hot[t, v] = (ids[t] == v).  The MXU matmul then
    # performs gather + concat + sqrt(d) scale (scale folded into the tables).
    iota_c = jax.lax.broadcasted_iota(jnp.int32, (tile_n, vc_pad), 1)
    hot_c = (iota_c == cids).astype(ctab_ref.dtype)          # (TILE_N, VC_PAD)
    out_c = jnp.dot(hot_c, ctab_ref[...], preferred_element_type=jnp.float32)

    iota_a = jax.lax.broadcasted_iota(jnp.int32, (tile_n, va_pad), 1)
    hot_a = (iota_a == aids).astype(atab_ref.dtype)          # (TILE_N, VA_PAD)
    out_a = jnp.dot(hot_a, atab_ref[...], preferred_element_type=jnp.float32)

    # Token-major tile written directly in the caller's layout: no wrapper
    # transpose / extra HBM pass (accepting masked stores since d_total < 128).
    out_ref[...] = jnp.concatenate([out_c, out_a], axis=-1).astype(out_ref.dtype)


def _prep_table(table, d_total, dtype):
    """Pad vocab to a lane multiple, fold in sqrt(d_total), enforce padding_idx=0."""
    v, d = table.shape
    v_pad = _round_up(v, 128)
    scale = math.sqrt(float(d_total))
    t = jnp.zeros((v_pad, d), dtype=dtype)
    t = t.at[:v].set(table.astype(dtype) * jnp.asarray(scale, dtype))
    t = t.at[0].set(0.0)        # padding_idx=0, enforced regardless of caller
    return t


def api_embedding_forward(class_ids, api_ids, class_table, api_table,
                          tile_n=2048, out_dtype=jnp.float32,
                          table_dtype=jnp.float32):
    """class_ids/api_ids: integer arrays of identical shape (e.g. (B, S));
    tables: (vocab, dim).  Returns ids.shape + (class_dim + api_dim,)."""
    lead_shape = class_ids.shape
    assert api_ids.shape == lead_shape
    n = int(math.prod(lead_shape)) if lead_shape else 1
    vc, dc = class_table.shape
    va, da = api_table.shape
    d_total = dc + da
    vc_pad = _round_up(vc, 128)
    va_pad = _round_up(va, 128)

    # VMEM budget: the transient (TILE_N, V_pad) one-hots dominate for larger
    # vocabs -- cap TILE_N so each stays under ~8 MiB (safe within the 32 MiB
    # scoped limit on v5e/v6e/v7x, well under v7x's 64 MiB physical VMEM).
    bytes_per_elt = jnp.dtype(table_dtype).itemsize
    onehot_budget = 8 * 1024 * 1024
    tile_cap = max(
        128, (onehot_budget // (max(vc_pad, va_pad) * bytes_per_elt)) // 128 * 128)

    n_pad = _round_up(max(n, 1), 128)
    # Prefer >= 2 grid steps so the "parallel" axis can shard across both v7x
    # TensorCores; a no-op on v5e/v6e (single TC) and for very small N.
    tile_n = min(tile_n, tile_cap, _round_up((n_pad + 1) // 2, 128))
    n_pad = _round_up(n_pad, tile_n)

    cflat = class_ids.reshape(-1).astype(jnp.int32)
    aflat = api_ids.reshape(-1).astype(jnp.int32)
    cids = jnp.pad(cflat, (0, n_pad - n)).reshape(n_pad, 1)   # pad id 0 -> zero row
    aids = jnp.pad(aflat, (0, n_pad - n)).reshape(n_pad, 1)

    ctab = _prep_table(class_table, d_total, table_dtype)     # (VC_PAD, DC)
    atab = _prep_table(api_table, d_total, table_dtype)       # (VA_PAD, DA)

    grid = (n_pad // tile_n,)
    out = pl.pallas_call(
        _embed_kernel,
        out_shape=jax.ShapeDtypeStruct((n_pad, d_total), out_dtype),
        grid_spec=pltpu.PrefetchScalarGridSpec(
            num_scalar_prefetch=0,
            grid=grid,
            in_specs=[
                # Per-tile id columns (double-buffered by the pipeline).
                pl.BlockSpec((tile_n, 1), lambda i: (i, 0)),
                pl.BlockSpec((tile_n, 1), lambda i: (i, 0)),
                # Tiny pre-scaled tables, resident across all row tiles
                # (constant block index -> fetched once, not per step).
                pl.BlockSpec((vc_pad, dc), lambda i: (0, 0)),
                pl.BlockSpec((va_pad, da), lambda i: (0, 0)),
            ],
            # Token-major output tile: the kernel emits the final layout.
            out_specs=pl.BlockSpec((tile_n, d_total), lambda i: (i, 0)),
        ),
        compiler_params=pltpu.CompilerParams(
            dimension_semantics=("parallel",),
            vmem_limit_bytes=32 * 1024 * 1024,
        ),
    )(cids, aids, ctab, atab)

    # Contiguous row trim + reshape only (no transpose, no full extra HBM pass).
    return out[:n].reshape(*lead_shape, d_total)


def make_embedding_table(key, vocab_size, embed_dim):
    tab = jax.random.normal(key, (vocab_size, embed_dim), dtype=jnp.float32)
    # padding_idx=0 -> row 0 is all zeros (matches nn.Embedding padding_idx)
    return tab.at[0].set(0.0)


if __name__ == "__main__":
    # Small deterministic setup.
    api_vocab_size, api_embed_dim = 64, 16
    class_vocab_size, class_embed_dim = 32, 16
    batch, seq = 2, 8

    key = jax.random.PRNGKey(0)
    k1, k2, k3, k4 = jax.random.split(key, 4)

    class_table = make_embedding_table(k1, class_vocab_size, class_embed_dim)
    api_table = make_embedding_table(k2, api_vocab_size, api_embed_dim)

    class_ids = jax.random.randint(
        k3, (batch, seq), 0, class_vocab_size, dtype=jnp.int32)
    api_ids = jax.random.randint(
        k4, (batch, seq), 0, api_vocab_size, dtype=jnp.int32)

    out = api_embedding_forward(class_ids, api_ids, class_table, api_table)
    out = jax.block_until_ready(out)

    # Reference check in plain JAX (same semantics as the PyTorch module).
    scale = math.sqrt(class_embed_dim + api_embed_dim)
    ref = jnp.concatenate(
        [class_table[class_ids], api_table[api_ids]], axis=-1
    ) * scale
    assert out.shape == (batch, seq, class_embed_dim + api_embed_dim)
    assert jnp.allclose(out, ref, atol=1e-5), "mismatch vs reference"

    print("KERNEL_OK")
</pallas_src>

<mosaic_0001>
module attributes {stable_mosaic.version = 11 : i64} {
  func.func @_embed_kernel(%arg0: i32, %arg1: memref<128x1xi32, #tpu.memory_space<vmem>>, %arg2: memref<128x1xi32, #tpu.memory_space<vmem>>, %arg3: memref<128x16xf32, #tpu.memory_space<vmem>>, %arg4: memref<128x16xf32, #tpu.memory_space<vmem>>, %arg5: memref<128x32xf32, #tpu.memory_space<vmem>>) attributes {dimension_semantics = [#tpu.dimension_semantics<parallel>], iteration_bounds = array<i64: 1>, scalar_prefetch = 0 : i64, scratch_operands = 0 : i64, tpu.core_type = #tpu.core_type<tc>, window_params = [{transform_indices = @transform_0, window_bounds = array<i64: 128, 1>}, {transform_indices = @transform_1, window_bounds = array<i64: 128, 1>}, {pipeline_mode = #tpu.pipeline_mode<synchronous>, transform_indices = @transform_2, window_bounds = array<i64: 128, 16>}, {pipeline_mode = #tpu.pipeline_mode<synchronous>, transform_indices = @transform_3, window_bounds = array<i64: 128, 16>}, {transform_indices = @transform_4, window_bounds = array<i64: 128, 32>}]} {
    %c0 = arith.constant 0 : index
    %c0_0 = arith.constant 0 : index
    %0 = vector.load %arg1[%c0, %c0_0] : memref<128x1xi32, #tpu.memory_space<vmem>>, vector<128x1xi32>
    %c0_1 = arith.constant 0 : index
    %c0_2 = arith.constant 0 : index
    %1 = vector.load %arg2[%c0_1, %c0_2] : memref<128x1xi32, #tpu.memory_space<vmem>>, vector<128x1xi32>
    %2 = tpu.iota {dimensions = array<i32: 1>} : vector<128x128xi32>
    %3 = vector.broadcast %0 : vector<128x1xi32> to vector<128x128xi32>
    %4 = arith.cmpi eq, %2, %3 : vector<128x128xi32>
    %5 = arith.extui %4 : vector<128x128xi1> to vector<128x128xi32>
    %6 = arith.sitofp %5 : vector<128x128xi32> to vector<128x128xf32>
    %c0_3 = arith.constant 0 : index
    %c0_4 = arith.constant 0 : index
    %7 = vector.load %arg3[%c0_3, %c0_4] : memref<128x16xf32, #tpu.memory_space<vmem>>, vector<128x16xf32>
    %cst = arith.constant dense<0.000000e+00> : vector<128x16xf32>
    %8 = tpu.matmul %6, %7, %cst {dimension_numbers = #tpu.dot_dimension_numbers<[1], [0], [0], [1], [0, 0, 1, 1], [], []>} : vector<128x128xf32>, vector<128x16xf32>, vector<128x16xf32> -> vector<128x16xf32>
    %9 = tpu.iota {dimensions = array<i32: 1>} : vector<128x128xi32>
    %10 = vector.broadcast %1 : vector<128x1xi32> to vector<128x128xi32>
    %11 = arith.cmpi eq, %9, %10 : vector<128x128xi32>
    %12 = arith.extui %11 : vector<128x128xi1> to vector<128x128xi32>
    %13 = arith.sitofp %12 : vector<128x128xi32> to vector<128x128xf32>
    %c0_5 = arith.constant 0 : index
    %c0_6 = arith.constant 0 : index
    %14 = vector.load %arg4[%c0_5, %c0_6] : memref<128x16xf32, #tpu.memory_space<vmem>>, vector<128x16xf32>
    %cst_7 = arith.constant dense<0.000000e+00> : vector<128x16xf32>
    %15 = tpu.matmul %13, %14, %cst_7 {dimension_numbers = #tpu.dot_dimension_numbers<[1], [0], [0], [1], [0, 0, 1, 1], [], []>} : vector<128x128xf32>, vector<128x16xf32>, vector<128x16xf32> -> vector<128x16xf32>
    %16 = tpu.concatenate %8, %15 in 1 : vector<128x16xf32>, vector<128x16xf32> -> vector<128x32xf32>
    %c0_8 = arith.constant 0 : index
    %c0_9 = arith.constant 0 : index
    %17 = vector.load %arg5[%c0_8, %c0_9] : memref<128x32xf32, #tpu.memory_space<vmem>>, vector<128x32xf32>
    tpu.vector_store %arg5[%c0_8, %c0_9], %16 {strides = array<i32>} : memref<128x32xf32, #tpu.memory_space<vmem>>, vector<128x32xf32>,
    return
  }
  func.func @transform_0(%arg0: i32) -> (i32, i32) {
    %c0_i32 = arith.constant 0 : i32
    %c0_i32_0 = arith.constant 0 : i32
    return %arg0, %c0_i32 : i32, i32
  }
  func.func @transform_1(%arg0: i32) -> (i32, i32) {
    %c0_i32 = arith.constant 0 : i32
    %c0_i32_0 = arith.constant 0 : i32
    return %arg0, %c0_i32 : i32, i32
  }
  func.func @transform_2(%arg0: i32) -> (i32, i32) {
    %c0_i32 = arith.constant 0 : i32
    %c0_i32_0 = arith.constant 0 : i32
    %c0_i32_1 = arith.constant 0 : i32
    return %c0_i32, %c0_i32_0 : i32, i32
  }
  func.func @transform_3(%arg0: i32) -> (i32, i32) {
    %c0_i32 = arith.constant 0 : i32
    %c0_i32_0 = arith.constant 0 : i32
    %c0_i32_1 = arith.constant 0 : i32
    return %c0_i32, %c0_i32_0 : i32, i32
  }
  func.func @transform_4(%arg0: i32) -> (i32, i32) {
    %c0_i32 = arith.constant 0 : i32
    %c0_i32_0 = arith.constant 0 : i32
    return %arg0, %c0_i32 : i32, i32
  }
}

</mosaic_0001>

<bundles_post_ra>
// kernel: tpu_custom_call.1
= control target key start
LH: loop header
LB: loop body
LE: loop exit
PB: predicated region body
PF: predicated region fallthrough
CT: control target
= control target key end

     0   :  { %v976_v0 = vmov 0   ;;  %s1358_s1 = inlined_call_operand.vmem [shape: s32[128,1], index: 1, kind: input, shape index: {}]   ;;  %s1359_s3 = inlined_call_operand.vmem [shape: f32[128,16], index: 3, kind: input, shape index: {}]   ;;  %s1360_s2 = inlined_call_operand.vmem [shape: f32[128,16], index: 2, kind: input, shape index: {}]   ;;  %s1361_s0 = inlined_call_operand.vmem [shape: s32[128,1], index: 0, kind: input, shape index: {}]   ;;  %s1362_s4 = inlined_call_operand.vmem [shape: f32[128,32], index: 4, kind: output, shape index: {}]  }
   0x1   :  { %975 = vset.pattern.permute.xlu1 %v976_v0  ;;  %974 = vset.pattern.permute.xlu0 %v976_v0  ;;  %v35_v1 = vld [vmem:[%s1358_s1 + $0x10] sm:$0xff]  ;;  %v33_v2 = vld [vmem:[%s1358_s1] sm:$0xff]  ;;  %v36_v3 = vld [vmem:[%s1358_s1 + $0x18] sm:$0xff] }
   0x2   :  { %315 = vperm.xlu1 %975, %v35_v1   ;;  %309 = vperm.xlu0 %974, %v33_v2   ;;  %v34_v4 = vld [vmem:[%s1358_s1 + $0x8] sm:$0xff]  ;;  %v37_v6 = vld [vmem:[%s1358_s1 + $0x20] sm:$0xff]  ;;  %v40_v7 = vld [vmem:[%s1358_s1 + $0x38] sm:$0xff] }
   0x3   :  { %v38_v5 = vld [vmem:[%s1358_s1 + $0x28] sm:$0xff]  ;;  %v39_v8 = vld [vmem:[%s1358_s1 + $0x30] sm:$0xff]  ;;  %v404_v9 = vld [vmem:[%s1359_s3] sm:$0xff] }
   0x4   :  { %v405_v10 = vld [vmem:[%s1359_s3 + $0x8] sm:$0xff]  ;;  %v406_v11 = vld [vmem:[%s1359_s3 + $0x10] sm:$0xff]  ;;  %v407_v12 = vld [vmem:[%s1359_s3 + $0x18] sm:$0xff] }
   0x5   :  { %v939_v13 = vpack.c.bf16 %v405_v10, %v404_v9  ;;  %v943_v14 = vpack.c.bf16 %v407_v12, %v406_v11  ;;  %v408_v15 = vld [vmem:[%s1359_s3 + $0x20] sm:$0xff]  ;;  %v409_v16 = vld [vmem:[%s1359_s3 + $0x28] sm:$0xff]  ;;  %v149_v22 = vld [vmem:[%s1360_s2 + $0x10] sm:$0xff] }
   0x6   :  { %318 = vperm.xlu1 %975, %v36_v3   ;;  %312 = vperm.xlu0 %974, %v34_v4   ;;  %v42_v17 = vld [vmem:[%s1358_s1 + $0x48] sm:$0xff]  ;;  %v41_v18 = vld [vmem:[%s1358_s1 + $0x40] sm:$0xff]  ;;  %v947_v19 = vpack.c.bf16 %v409_v16, %v408_v15  ;;  %v410_v23 = vld [vmem:[%s1359_s3 + $0x30] sm:$0xff] }
   0x7   :  { %940 = vmatprep.subr.bf16.mxu1 %v939_v13  ;;  %v147_v20 = vld [vmem:[%s1360_s2] sm:$0xff]  ;;  %v148_v21 = vld [vmem:[%s1360_s2 + $0x8] sm:$0xff]  ;;  %v411_v24 = vld [vmem:[%s1359_s3 + $0x38] sm:$0xff] }
   0x8   :  { %942 = vmatpush3.bf16.msra.mxu1 %v939_v13  ;;  %v907_v25 = vpack.c.bf16 %v148_v21, %v147_v20  ;;  %v150_v26 = vld [vmem:[%s1360_s2 + $0x18] sm:$0xff]  ;;  %v43_v28 = vld [vmem:[%s1358_s1 + $0x50] sm:$0xff]  ;;  %v151_v30 = vld [vmem:[%s1360_s2 + $0x20] sm:$0xff]  ;;  %v951_v32 = vpack.c.bf16 %v411_v24, %v410_v23  ;;  %v977_v21 = vmov 1.0  }
   0x9   :  { %944 = vmatprep.subr.bf16.mxu1 %v943_v14  ;;  %v44_v27 = vld [vmem:[%s1358_s1 + $0x58] sm:$0xff]  ;;  %v911_v29 = vpack.c.bf16 %v150_v26, %v149_v22  ;;  %v152_v31 = vld [vmem:[%s1360_s2 + $0x28] sm:$0xff]  ;;  %v412_v33 = vld [vmem:[%s1359_s3 + $0x40] sm:$0xff] }
   0xa   :  { %324 = vperm.xlu1 %975, %v38_v5   ;;  %321 = vperm.xlu0 %974, %v37_v6   ;;  %v413_v34 = vld [vmem:[%s1359_s3 + $0x48] sm:$0xff]  ;;  %v45_v36 = vld [vmem:[%s1358_s1 + $0x60] sm:$0xff]  ;;  %v915_v37 = vpack.c.bf16 %v152_v31, %v151_v30  ;;  %v153_v38 = vld [vmem:[%s1360_s2 + $0x30] sm:$0xff] }
   0xb   :  { %908 = vmatprep.subr.bf16.mxu0 %v907_v25  ;;  %v46_v35 = vld [vmem:[%s1358_s1 + $0x68] sm:$0xff]  ;;  %v154_v39 = vld [vmem:[%s1360_s2 + $0x38] sm:$0xff]  ;;  %v955_v40 = vpack.c.bf16 %v413_v34, %v412_v33  ;;  %v414_v41 = vld [vmem:[%s1359_s3 + $0x50] sm:$0xff] }
   0xc   :  { %946 = vmatpush3.bf16.msra.mxu1 %v943_v14  ;;  %910 = vmatpush3.bf16.msra.mxu0 %v907_v25  ;;  %v415_v42 = vld [vmem:[%s1359_s3 + $0x58] sm:$0xff]  ;;  %v47_v44 = vld [vmem:[%s1358_s1 + $0x70] sm:$0xff]  ;;  %v919_v45 = vpack.c.bf16 %v154_v39, %v153_v38  ;;  %v155_v46 = vld [vmem:[%s1360_s2 + $0x40] sm:$0xff] }
   0xd   :  { %948 = vmatprep.subr.bf16.mxu1 %v947_v19  ;;  %912 = vmatprep.subr.bf16.mxu0 %v911_v29  ;;  %v48_v43 = vld [vmem:[%s1358_s1 + $0x78] sm:$0xff]  ;;  %v156_v47 = vld [vmem:[%s1360_s2 + $0x48] sm:$0xff]  ;;  %v959_v48 = vpack.c.bf16 %v415_v42, %v414_v41  ;;  %v416_v49 = vld [vmem:[%s1359_s3 + $0x60] sm:$0xff] }
   0xe   :  { %330 = vperm.xlu1 %975, %v40_v7   ;;  %327 = vperm.xlu0 %974, %v39_v8   ;;  %v417_v50 = vld [vmem:[%s1359_s3 + $0x68] sm:$0xff]  ;;  %v17_v52 = vld [vmem:[%s1361_s0] sm:$0xff]  ;;  %v923_v53 = vpack.c.bf16 %v156_v47, %v155_v46  ;;  %v157_v54 = vld [vmem:[%s1360_s2 + $0x50] sm:$0xff] }
   0xf   :  { %v18_v51 = vld [vmem:[%s1361_s0 + $0x8] sm:$0xff]  ;;  %v158_v55 = vld [vmem:[%s1360_s2 + $0x58] sm:$0xff]  ;;  %v963_v56 = vpack.c.bf16 %v417_v50, %v416_v49  ;;  %v418_v57 = vld [vmem:[%s1359_s3 + $0x70] sm:$0xff] }
  0x10   :  { %950 = vmatpush3.bf16.msra.mxu1 %v947_v19  ;;  %914 = vmatpush3.bf16.msra.mxu0 %v911_v29  ;;  %v419_v58 = vld [vmem:[%s1359_s3 + $0x78] sm:$0xff]  ;;  %v19_v60 = vld [vmem:[%s1361_s0 + $0x10] sm:$0xff]  ;;  %v927_v61 = vpack.c.bf16 %v158_v55, %v157_v54  ;;  %v159_v62 = vld [vmem:[%s1360_s2 + $0x60] sm:$0xff] }
  0x11   :  { %952 = vmatprep.subr.bf16.mxu1 %v951_v32  ;;  %916 = vmatprep.subr.bf16.mxu0 %v915_v37  ;;  %v20_v59 = vld [vmem:[%s1361_s0 + $0x18] sm:$0xff]  ;;  %v160_v63 = vld [vmem:[%s1360_s2 + $0x68] sm:$0xff]  ;;  %v967_v0 = vpack.c.bf16 %v419_v58, %v418_v57  ;;  %v21_v2 = vld [vmem:[%s1361_s0 + $0x20] sm:$0xff] }
  0x12   :  { %336 = vperm.xlu1 %975, %v42_v17   ;;  %333 = vperm.xlu0 %974, %v41_v18   ;;  %v22_v1 = vld [vmem:[%s1361_s0 + $0x28] sm:$0xff]  ;;  %v931_v3 = vpack.c.bf16 %v160_v63, %v159_v62  ;;  %v161_v4 = vld [vmem:[%s1360_s2 + $0x70] sm:$0xff]  ;;  %v162_v5 = vld [vmem:[%s1360_s2 + $0x78] sm:$0xff]  ;;  %v49_v17 = vlaneseq }
  0x13   :  { %v24_v6 = vld [vmem:[%s1361_s0 + $0x38] sm:$0xff]  ;;  %v23_v7 = vld [vmem:[%s1361_s0 + $0x30] sm:$0xff]  ;;  %v935_v8 = vpack.c.bf16 %v162_v5, %v161_v4  ;;  %v26_v9 = vld [vmem:[%s1361_s0 + $0x48] sm:$0xff] }
  0x14   :  { %954 = vmatpush3.bf16.msra.mxu1 %v951_v32  ;;  %918 = vmatpush3.bf16.msra.mxu0 %v915_v37  ;;  %v25_v10 = vld [vmem:[%s1361_s0 + $0x40] sm:$0xff]  ;;  %v28_v11 = vld [vmem:[%s1361_s0 + $0x58] sm:$0xff]  ;;  %v27_v12 = vld [vmem:[%s1361_s0 + $0x50] sm:$0xff]  ;;  %v1196_v18 = vand.u32 127, %v49_v17 }
  0x15   :  { %956 = vmatprep.subr.bf16.mxu1 %v955_v40  ;;  %920 = vmatprep.subr.bf16.mxu0 %v919_v45  ;;  %v30_v13 = vld [vmem:[%s1361_s0 + $0x68] sm:$0xff]  ;;  %v29_v14 = vld [vmem:[%s1361_s0 + $0x60] sm:$0xff]  ;;  %v32_v15 = vld [vmem:[%s1361_s0 + $0x78] sm:$0xff] }
  0x16   :  { %342 = vperm.xlu1 %975, %v44_v27   ;;  %339 = vperm.xlu0 %974, %v43_v28   ;;  %v31_v16 = vld [vmem:[%s1361_s0 + $0x70] sm:$0xff]  ;;  %s978_s0 = smov 16  }
  0x18   :  { %958 = vmatpush3.bf16.msra.mxu1 %v955_v40  ;;  %922 = vmatpush3.bf16.msra.mxu0 %v919_v45 }
  0x19   :  { %960 = vmatprep.subr.bf16.mxu1 %v959_v48  ;;  %924 = vmatprep.subr.bf16.mxu0 %v923_v53 }
  0x1a   :  { %348 = vperm.xlu1 %975, %v46_v35   ;;  %345 = vperm.xlu0 %974, %v45_v36  }
  0x1c   :  { %962 = vmatpush3.bf16.msra.mxu1 %v959_v48  ;;  %926 = vmatpush3.bf16.msra.mxu0 %v923_v53 }
  0x1d   :  { %964 = vmatprep.subr.bf16.mxu1 %v963_v56  ;;  %928 = vmatprep.subr.bf16.mxu0 %v927_v61 }
  0x1e   :  { %354 = vperm.xlu1 %975, %v48_v43   ;;  %351 = vperm.xlu0 %974, %v47_v44  }
  0x20   :  { %966 = vmatpush3.bf16.msra.mxu1 %v963_v56  ;;  %930 = vmatpush3.bf16.msra.mxu0 %v927_v61 }
  0x21   :  { %968 = vmatprep.subr.bf16.mxu1 %v967_v0  ;;  %932 = vmatprep.subr.bf16.mxu0 %v931_v3 }
  0x22   :  { %55 = vperm.xlu1 %975, %v18_v51   ;;  %52 = vperm.xlu0 %974, %v17_v52  }
  0x24   :  { %970 = vmatpush3.bf16.msra.mxu1 %v967_v0  ;;  %934 = vmatpush3.bf16.msra.mxu0 %v931_v3 }
  0x25   :  { %936 = vmatprep.subr.bf16.mxu0 %v935_v8 }
  0x26   :  { %61 = vperm.xlu1 %975, %v20_v59   ;;  %58 = vperm.xlu0 %974, %v19_v60  }
  0x28   :  { %938 = vmatpush3.bf16.msra.mxu0 %v935_v8 }
  0x2a   :  { %67 = vperm.xlu1 %975, %v22_v1   ;;  %64 = vperm.xlu0 %974, %v21_v2  }
  0x2e   :  { %73 = vperm.xlu1 %975, %v24_v6   ;;  %70 = vperm.xlu0 %974, %v23_v7  }
  0x32   :  { %79 = vperm.xlu1 %975, %v26_v9   ;;  %76 = vperm.xlu0 %974, %v25_v10  }
  0x36   :  { %85 = vperm.xlu1 %975, %v28_v11   ;;  %82 = vperm.xlu0 %974, %v27_v12  }
  0x3a   :  { %91 = vperm.xlu1 %975, %v30_v13   ;;  %88 = vperm.xlu0 %974, %v29_v14  }
  0x3e   :  { %97 = vperm.xlu1 %975, %v32_v15   ;;  %94 = vperm.xlu0 %974, %v31_v16  }
  0x81   :  { %v316_v19 = vpop.permute.xlu1 %315  ;;  %v310_v20 = vpop.permute.xlu0 %309 }
  0x82   :  { %vm356_vm0 = vcmp.eq.s32.totalorder %v1196_v18, %v310_v20  ;;  %vm358_vm1 = vcmp.eq.s32.totalorder %v1196_v18, %v316_v19 }
  0x83   :  { %883 = vmatprep.mubr.msk.f32.mxu1 %vm356_vm0, %v977_v21 }
  0x85   :  { %v319_v22 = vpop.permute.xlu1 %318  ;;  %v313_v23 = vpop.permute.xlu0 %312 }
  0x86   :  { %vm357_vm2 = vcmp.eq.s32.totalorder %v1196_v18, %v313_v23  ;;  %vm359_vm3 = vcmp.eq.s32.totalorder %v1196_v18, %v319_v22 }
  0x87   :  { %884 = vmatmul.mubr.msk.f32.vlgmr.msra.gmra.mrb[0].mxu1 %vm357_vm2, %v977_v21 }
  0x88   :  { %886 = vmatprep.mubr.msk.f32.mxu1 %vm358_vm1, %v977_v21 }
  0x89   :  { %v325_v24 = vpop.permute.xlu1 %324  ;;  %v322_v25 = vpop.permute.xlu0 %321 }
  0x8a   :  { %vm360_vm4 = vcmp.eq.s32.totalorder %v1196_v18, %v322_v25  ;;  %vm361_vm5 = vcmp.eq.s32.totalorder %v1196_v18, %v325_v24 }
  0x8b   :  { %887 = vmatmul.mubr.msk.f32.gmra.mrb[2].mxu1 %vm359_vm3, %v977_v21 }
  0x8c   :  { %889 = vmatprep.mubr.msk.f32.mxu1 %vm360_vm4, %v977_v21 }
  0x8d   :  { %v331_v26 = vpop.permute.xlu1 %330  ;;  %v328_v27 = vpop.permute.xlu0 %327 }
  0x8e   :  { %vm362_vm6 = vcmp.eq.s32.totalorder %v1196_v18, %v328_v27  ;;  %vm363_vm7 = vcmp.eq.s32.totalorder %v1196_v18, %v331_v26 }
  0x8f   :  { %890 = vmatmul.mubr.msk.f32.gmra.mrb[4].mxu1 %vm361_vm5, %v977_v21 }
  0x90   :  { %892 = vmatprep.mubr.msk.f32.mxu1 %vm362_vm6, %v977_v21 }
  0x91   :  { %v337_v28 = vpop.permute.xlu1 %336  ;;  %v334_v29 = vpop.permute.xlu0 %333 }
  0x92   :  { %vm364_vm8 = vcmp.eq.s32.totalorder %v1196_v18, %v334_v29  ;;  %vm365_vm9 = vcmp.eq.s32.totalorder %v1196_v18, %v337_v28 }
  0x93   :  { %893 = vmatmul.mubr.msk.f32.gmra.mrb[6].mxu1 %vm363_vm7, %v977_v21 }
  0x94   :  { %895 = vmatprep.mubr.msk.f32.mxu1 %vm364_vm8, %v977_v21 }
  0x95   :  { %v343_v30 = vpop.permute.xlu1 %342  ;;  %v340_v31 = vpop.permute.xlu0 %339 }
  0x96   :  { %vm366_vm10 = vcmp.eq.s32.totalorder %v1196_v18, %v340_v31  ;;  %vm367_vm11 = vcmp.eq.s32.totalorder %v1196_v18, %v343_v30 }
  0x97   :  { %896 = vmatmul.mubr.msk.f32.gmra.mrb[8].mxu1 %vm365_vm9, %v977_v21 }
  0x98   :  { %898 = vmatprep.mubr.msk.f32.mxu1 %vm366_vm10, %v977_v21 }
  0x99   :  { %v349_v32 = vpop.permute.xlu1 %348  ;;  %v346_v33 = vpop.permute.xlu0 %345 }
  0x9a   :  { %vm368_vm12 = vcmp.eq.s32.totalorder %v1196_v18, %v346_v33  ;;  %vm369_vm13 = vcmp.eq.s32.totalorder %v1196_v18, %v349_v32 }
  0x9b   :  { %899 = vmatmul.mubr.msk.f32.gmra.mrb[10].mxu1 %vm367_vm11, %v977_v21 }
  0x9c   :  { %901 = vmatprep.mubr.msk.f32.mxu1 %vm368_vm12, %v977_v21 }
  0x9d   :  { %v355_v34 = vpop.permute.xlu1 %354  ;;  %v352_v35 = vpop.permute.xlu0 %351 }
  0x9e   :  { %vm370_vm14 = vcmp.eq.s32.totalorder %v1196_v18, %v352_v35  ;;  %vm371_vm15 = vcmp.eq.s32.totalorder %v1196_v18, %v355_v34 }
  0x9f   :  { %902 = vmatmul.mubr.msk.f32.gmra.mrb[12].mxu1 %vm369_vm13, %v977_v21 }
  0xa0   :  { %904 = vmatprep.mubr.msk.f32.mxu1 %vm370_vm14, %v977_v21 }
  0xa1   :  { %v56_v36 = vpop.permute.xlu1 %55  ;;  %v53_v37 = vpop.permute.xlu0 %52 }
  0xa2   :  { %vm100_vm0 = vcmp.eq.s32.totalorder %v1196_v18, %v56_v36  ;;  %vm99_vm1 = vcmp.eq.s32.totalorder %v1196_v18, %v53_v37 }
  0xa3   :  { %827 = vmatprep.mubr.msk.f32.mxu0 %vm99_vm1, %v977_v21  ;;  %905 = vmatmul.mubr.msk.f32.gmra.mrb[14].mxu1 %vm371_vm15, %v977_v21  ;;  %vm646_vm1 = vcmask 261120  }
  0xa4   :  { %828 = vmatmul.mubr.msk.f32.vlgmr.msra.gmra.mrb[0].mxu0 %vm100_vm0, %v977_v21  ;;  %vm629_vm0 = vcmask 130048  }
  0xa5   :  { %v62_v38 = vpop.permute.xlu1 %61  ;;  %v59_v39 = vpop.permute.xlu0 %58 }
  0xa6   :  { %vm102_vm2 = vcmp.eq.s32.totalorder %v1196_v18, %v62_v38  ;;  %vm101_vm3 = vcmp.eq.s32.totalorder %v1196_v18, %v59_v39 }
  0xa7   :  { %830 = vmatprep.mubr.msk.f32.mxu0 %vm101_vm3, %v977_v21 }
  0xa8   :  { %831 = vmatmul.mubr.msk.f32.gmra.mrb[2].mxu0 %vm102_vm2, %v977_v21 }
  0xa9   :  { %v68_v40 = vpop.permute.xlu1 %67  ;;  %v65_v41 = vpop.permute.xlu0 %64 }
  0xaa   :  { %vm104_vm4 = vcmp.eq.s32.totalorder %v1196_v18, %v68_v40  ;;  %vm103_vm5 = vcmp.eq.s32.totalorder %v1196_v18, %v65_v41 }
  0xab   :  { %833 = vmatprep.mubr.msk.f32.mxu0 %vm103_vm5, %v977_v21 }
  0xac   :  { %834 = vmatmul.mubr.msk.f32.gmra.mrb[4].mxu0 %vm104_vm4, %v977_v21 }
  0xad   :  { %v74_v42 = vpop.permute.xlu1 %73  ;;  %v71_v43 = vpop.permute.xlu0 %70 }
  0xae   :  { %vm106_vm6 = vcmp.eq.s32.totalorder %v1196_v18, %v74_v42  ;;  %vm105_vm7 = vcmp.eq.s32.totalorder %v1196_v18, %v71_v43 }
  0xaf   :  { %836 = vmatprep.mubr.msk.f32.mxu0 %vm105_vm7, %v977_v21 }
  0xb0   :  { %837 = vmatmul.mubr.msk.f32.gmra.mrb[6].mxu0 %vm106_vm6, %v977_v21 }
  0xb1   :  { %v80_v44 = vpop.permute.xlu1 %79  ;;  %v77_v45 = vpop.permute.xlu0 %76 }
  0xb2   :  { %vm108_vm8 = vcmp.eq.s32.totalorder %v1196_v18, %v80_v44  ;;  %vm107_vm9 = vcmp.eq.s32.totalorder %v1196_v18, %v77_v45 }
  0xb3   :  { %839 = vmatprep.mubr.msk.f32.mxu0 %vm107_vm9, %v977_v21 }
  0xb4   :  { %840 = vmatmul.mubr.msk.f32.gmra.mrb[8].mxu0 %vm108_vm8, %v977_v21 }
  0xb5   :  { %v86_v46 = vpop.permute.xlu1 %85  ;;  %v83_v47 = vpop.permute.xlu0 %82 }
  0xb6   :  { %vm110_vm10 = vcmp.eq.s32.totalorder %v1196_v18, %v86_v46  ;;  %vm109_vm11 = vcmp.eq.s32.totalorder %v1196_v18, %v83_v47 }
  0xb7   :  { %842 = vmatprep.mubr.msk.f32.mxu0 %vm109_vm11, %v977_v21 }
  0xb8   :  { %843 = vmatmul.mubr.msk.f32.gmra.mrb[10].mxu0 %vm110_vm10, %v977_v21 }
  0xb9   :  { %v92_v48 = vpop.permute.xlu1 %91  ;;  %v89_v49 = vpop.permute.xlu0 %88 }
  0xba   :  { %vm112_vm12 = vcmp.eq.s32.totalorder %v1196_v18, %v92_v48  ;;  %vm111_vm13 = vcmp.eq.s32.totalorder %v1196_v18, %v89_v49 }
  0xbb   :  { %845 = vmatprep.mubr.msk.f32.mxu0 %vm111_vm13, %v977_v21 }
  0xbc   :  { %846 = vmatmul.mubr.msk.f32.gmra.mrb[12].mxu0 %vm112_vm12, %v977_v21 }
  0xbd   :  { %v98_v50 = vpop.permute.xlu1 %97  ;;  %v95_v51 = vpop.permute.xlu0 %94 }
  0xbe   :  { %vm114_vm14 = vcmp.eq.s32.totalorder %v1196_v18, %v98_v50  ;;  %vm113_vm15 = vcmp.eq.s32.totalorder %v1196_v18, %v95_v51 }
  0xbf   :  { %848 = vmatprep.mubr.msk.f32.mxu0 %vm113_vm15, %v977_v21 }
  0xc0   :  { %849 = vmatmul.mubr.msk.f32.gmra.mrb[14].mxu0 %vm114_vm14, %v977_v21 }
 0x15a   :  { %v885_v52 = vpop.f32.mrb[0].mxu1 }
 0x15b   :  { %v486_v53 = vpop.f32.mrb[1].mxu1  ;;  %583 = vrot.lane.b32.xlu1 %v885_v52, %s978_s0 }
 0x15c   :  { %581 = vrot.lane.b32.xlu0 %v486_v53, %s978_s0 }
 0x15e   :  { %v888_v54 = vpop.f32.mrb[2].mxu1 }
 0x15f   :  { %v496_v55 = vpop.f32.mrb[3].mxu1  ;;  %587 = vrot.lane.b32.xlu1 %v888_v54, %s978_s0 }
 0x160   :  { %585 = vrot.lane.b32.xlu0 %v496_v55, %s978_s0 }
 0x162   :  { %v891_v56 = vpop.f32.mrb[4].mxu1 }
 0x163   :  { %v506_v57 = vpop.f32.mrb[5].mxu1  ;;  %591 = vrot.lane.b32.xlu1 %v891_v56, %s978_s0 }
 0x164   :  { %589 = vrot.lane.b32.xlu0 %v506_v57, %s978_s0 }
 0x166   :  { %v894_v58 = vpop.f32.mrb[6].mxu1 }
 0x167   :  { %v516_v59 = vpop.f32.mrb[7].mxu1  ;;  %595 = vrot.lane.b32.xlu1 %v894_v58, %s978_s0 }
 0x168   :  { %593 = vrot.lane.b32.xlu0 %v516_v59, %s978_s0 }
 0x16a   :  { %v897_v60 = vpop.f32.mrb[8].mxu1 }
 0x16b   :  { %v526_v61 = vpop.f32.mrb[9].mxu1  ;;  %599 = vrot.lane.b32.xlu1 %v897_v60, %s978_s0 }
 0x16c   :  { %597 = vrot.lane.b32.xlu0 %v526_v61, %s978_s0 }
 0x16e   :  { %v900_v62 = vpop.f32.mrb[10].mxu1 }
 0x16f   :  { %v536_v63 = vpop.f32.mrb[11].mxu1  ;;  %603 = vrot.lane.b32.xlu1 %v900_v62, %s978_s0 }
 0x170   :  { %601 = vrot.lane.b32.xlu0 %v536_v63, %s978_s0 }
 0x172   :  { %v903_v0 = vpop.f32.mrb[12].mxu1 }
 0x173   :  { %v546_v1 = vpop.f32.mrb[13].mxu1  ;;  %607 = vrot.lane.b32.xlu1 %v903_v0, %s978_s0 }
 0x174   :  { %605 = vrot.lane.b32.xlu0 %v546_v1, %s978_s0 }
 0x176   :  { %v906_v2 = vpop.f32.mrb[14].mxu1 }
 0x177   :  { %v556_v3 = vpop.f32.mrb[15].mxu1  ;;  %611 = vrot.lane.b32.xlu1 %v906_v2, %s978_s0  ;;  %v829_v4 = vpop.f32.mrb[0].mxu0 }
 0x178   :  { %609 = vrot.lane.b32.xlu0 %v556_v3, %s978_s0  ;;  %v229_v5 = vpop.f32.mrb[1].mxu0 }
 0x17b   :  { %v832_v6 = vpop.f32.mrb[2].mxu0 }
 0x17c   :  { %v239_v7 = vpop.f32.mrb[3].mxu0 }
 0x17f   :  { %v835_v8 = vpop.f32.mrb[4].mxu0 }
 0x180   :  { %v249_v9 = vpop.f32.mrb[5].mxu0 }
 0x183   :  { %v838_v10 = vpop.f32.mrb[6].mxu0 }
 0x184   :  { %v259_v11 = vpop.f32.mrb[7].mxu0 }
 0x187   :  { %v841_v12 = vpop.f32.mrb[8].mxu0 }
 0x188   :  { %v269_v13 = vpop.f32.mrb[9].mxu0 }
 0x18b   :  { %v844_v14 = vpop.f32.mrb[10].mxu0 }
 0x18c   :  { %v279_v15 = vpop.f32.mrb[11].mxu0 }
 0x18f   :  { %v847_v16 = vpop.f32.mrb[12].mxu0 }
 0x190   :  { %v289_v17 = vpop.f32.mrb[13].mxu0 }
 0x193   :  { %v850_v18 = vpop.f32.mrb[14].mxu0 }
 0x194   :  { %v299_v19 = vpop.f32.mrb[15].mxu0 }
 0x1cd   :  { %v584_v20 = vpop.permute.xlu1 %583 }
 0x1ce   :  { %v631_v21 = vsel %vm629_vm0, %v829_v4, %v584_v20  ;;  %v582_v22 = vpop.permute.xlu0 %581 }
 0x1cf   :  { %648 = vst.msk [vmem:[%s1362_s4 + $0x8] sm:$0xff] %vm646_vm1, %v631_v21  ;;  %v630_v23 = vsel %vm629_vm0, %v229_v5, %v582_v22 }
 0x1d0   :  { %647 = vst.msk [vmem:[%s1362_s4] sm:$0xff] %vm646_vm1, %v630_v23 }
 0x1d1   :  { %v588_v24 = vpop.permute.xlu1 %587 }
 0x1d2   :  { %v633_v25 = vsel %vm629_vm0, %v832_v6, %v588_v24  ;;  %v586_v26 = vpop.permute.xlu0 %585 }
 0x1d3   :  { %650 = vst.msk [vmem:[%s1362_s4 + $0x18] sm:$0xff] %vm646_vm1, %v633_v25  ;;  %v632_v27 = vsel %vm629_vm0, %v239_v7, %v586_v26 }
 0x1d4   :  { %649 = vst.msk [vmem:[%s1362_s4 + $0x10] sm:$0xff] %vm646_vm1, %v632_v27 }
 0x1d5   :  { %v592_v28 = vpop.permute.xlu1 %591 }
 0x1d6   :  { %v635_v29 = vsel %vm629_vm0, %v835_v8, %v592_v28  ;;  %v590_v30 = vpop.permute.xlu0 %589 }
 0x1d7   :  { %652 = vst.msk [vmem:[%s1362_s4 + $0x28] sm:$0xff] %vm646_vm1, %v635_v29  ;;  %v634_v31 = vsel %vm629_vm0, %v249_v9, %v590_v30 }
 0x1d8   :  { %651 = vst.msk [vmem:[%s1362_s4 + $0x20] sm:$0xff] %vm646_vm1, %v634_v31 }
 0x1d9   :  { %v596_v32 = vpop.permute.xlu1 %595 }
 0x1da   :  { %v637_v33 = vsel %vm629_vm0, %v838_v10, %v596_v32  ;;  %v594_v34 = vpop.permute.xlu0 %593 }
 0x1db   :  { %654 = vst.msk [vmem:[%s1362_s4 + $0x38] sm:$0xff] %vm646_vm1, %v637_v33  ;;  %v636_v35 = vsel %vm629_vm0, %v259_v11, %v594_v34 }
 0x1dc   :  { %653 = vst.msk [vmem:[%s1362_s4 + $0x30] sm:$0xff] %vm646_vm1, %v636_v35 }
 0x1dd   :  { %v600_v36 = vpop.permute.xlu1 %599 }
 0x1de   :  { %v639_v37 = vsel %vm629_vm0, %v841_v12, %v600_v36  ;;  %v598_v38 = vpop.permute.xlu0 %597 }
 0x1df   :  { %656 = vst.msk [vmem:[%s1362_s4 + $0x48] sm:$0xff] %vm646_vm1, %v639_v37  ;;  %v638_v39 = vsel %vm629_vm0, %v269_v13, %v598_v38 }
 0x1e0   :  { %655 = vst.msk [vmem:[%s1362_s4 + $0x40] sm:$0xff] %vm646_vm1, %v638_v39 }
 0x1e1   :  { %v604_v40 = vpop.permute.xlu1 %603 }
 0x1e2   :  { %v641_v41 = vsel %vm629_vm0, %v844_v14, %v604_v40  ;;  %v602_v42 = vpop.permute.xlu0 %601 }
 0x1e3   :  { %658 = vst.msk [vmem:[%s1362_s4 + $0x58] sm:$0xff] %vm646_vm1, %v641_v41  ;;  %v640_v43 = vsel %vm629_vm0, %v279_v15, %v602_v42 }
 0x1e4   :  { %657 = vst.msk [vmem:[%s1362_s4 + $0x50] sm:$0xff] %vm646_vm1, %v640_v43 }
 0x1e5   :  { %v608_v44 = vpop.permute.xlu1 %607 }
 0x1e6   :  { %v643_v45 = vsel %vm629_vm0, %v847_v16, %v608_v44  ;;  %v606_v46 = vpop.permute.xlu0 %605 }
 0x1e7   :  { %660 = vst.msk [vmem:[%s1362_s4 + $0x68] sm:$0xff] %vm646_vm1, %v643_v45  ;;  %v642_v47 = vsel %vm629_vm0, %v289_v17, %v606_v46 }
 0x1e8   :  { %659 = vst.msk [vmem:[%s1362_s4 + $0x60] sm:$0xff] %vm646_vm1, %v642_v47 }
 0x1e9   :  { %v612_v48 = vpop.permute.xlu1 %611 }
 0x1ea   :  { %v645_v49 = vsel %vm629_vm0, %v850_v18, %v612_v48  ;;  %v610_v50 = vpop.permute.xlu0 %609 }
 0x1eb   :  { %662 = vst.msk [vmem:[%s1362_s4 + $0x78] sm:$0xff] %vm646_vm1, %v645_v49  ;;  %v644_v51 = vsel %vm629_vm0, %v299_v19, %v610_v50 }
 0x1ec   :  { %661 = vst.msk [vmem:[%s1362_s4 + $0x70] sm:$0xff] %vm646_vm1, %v644_v51 }

</bundles_post_ra>
